<compile_context>
chip_gen: v7x
topology: tpu7x:2x2x1
jax: 0.10.0
libtpu: 0.0.40
codegen_flags: <defaults>
</compile_context>

<pallas_src>
import math

import jax
import jax.numpy as jnp
from jax.experimental import pallas as pl
from jax.experimental.pallas import tpu as pltpu


# ----------------------------- Pallas kernel ------------------------------- #

def _drop_path_kernel(scale_ref, x_ref, o_ref):
    # scale_ref: (TB, 1) per-sample keep/scale factor (x.dtype for 16-bit inputs, f32 else)
    # x_ref, o_ref: (TB, TL)
    o_ref[...] = (x_ref[...] * scale_ref[...]).astype(o_ref.dtype)


def _chip_budgets():
    """Returns (per-tile byte budget, vmem_limit cap), generation-aware with a safe fallback."""
    per_tile, vmem_cap = 6 << 20, 44 << 20          # safe everywhere (v7x: 64 MiB VMEM / TC)
    try:
        kind = jax.devices()[0].device_kind.lower()
        if "v7" in kind:
            per_tile, vmem_cap = 6 << 20, 44 << 20
        elif "v6" in kind or "v5" in kind or "v4" in kind:
            per_tile, vmem_cap = 8 << 20, 64 << 20  # 128 MiB physical VMEM
    except Exception:
        pass
    return per_tile, vmem_cap


def drop_path_pallas(x, scale, *, min_pallas_bytes=256 << 10, donate_x=False):
    """x: (B, ...) any rank; scale: (B,) per-sample multiplier. Returns x * scale (broadcast)."""
    orig_shape = x.shape
    B = orig_shape[0]
    L = int(math.prod(orig_shape[1:])) if len(orig_shape) > 1 else 1
    itemsize = jnp.dtype(x.dtype).itemsize
    total_bytes = B * L * itemsize

    # Tiny tensors: kernel-launch + per-grid-step overhead dominates; let XLA fuse it.
    if total_bytes < min_pallas_bytes:
        bshape = (B,) + (1,) * (x.ndim - 1)
        return x * scale.reshape(bshape).astype(x.dtype)

    per_tile_budget, vmem_cap = _chip_budgets()

    # Keep 16-bit inputs in packed low-precision vregs (bf16/fp16 VPU paths on v6e/v7x).
    # On v5e (no bf16 VALU) the compiler promotes internally; still correct.
    scale_dtype = x.dtype if itemsize == 2 else jnp.float32

    x2 = x.reshape(B, L)
    scale2 = scale.reshape(B, 1).astype(scale_dtype)

    # Sublane packing factor: 8 rows/f32, 16/bf16-fp16, 32/int8-fp8.
    pack = max(8, 32 // itemsize)

    # --- Lane tile TL: as wide as the per-tile budget allows (long contiguous HBM bursts
    #     are the whole roofline here); full L when it fits, else a multiple of 128. ---
    if L <= 128:
        TL = L
    else:
        max_tl = max(128, (per_tile_budget // (pack * itemsize)) // 128 * 128)
        TL = L if L <= max_tl else max_tl

    # --- Row tile TB: fill the rest of the tile budget, rounded to sublane packing. ---
    if B <= pack:
        TB = B
    else:
        rows_budget = max(pack, (per_tile_budget // max(TL * itemsize, 1)) // pack * pack)
        TB = B if rows_budget >= B else rows_budget

    # Keep the grid splittable so v7x's two TensorCores both get work on medium tensors.
    if pl.cdiv(B, TB) * pl.cdiv(L, TL) == 1:
        tl_half = (L // 2) // 128 * 128
        tb_half = (B // 2) // pack * pack
        if tl_half >= 128:
            TL = tl_half
        elif tb_half >= pack:
            TB = tb_half

    grid = (pl.cdiv(B, TB), pl.cdiv(L, TL))

    tile_bytes = TB * TL * itemsize
    # in + out, each double-buffered, plus the tiny scale operand and headroom.
    vmem_limit = int(max(8 << 20, min(4 * tile_bytes + (2 << 20), vmem_cap)))

    cost = pl.CostEstimate(
        flops=B * L,                       # one multiply per element
        transcendentals=0,
        bytes_accessed=2 * B * L * itemsize + B * jnp.dtype(scale_dtype).itemsize,
    )

    # NOTE: pipeline_mode=pl.Buffered(3) on the x/out specs is a few-percent lever if
    # profiling shows exposed DMA at tile boundaries; left at the default depth of 2.
    out = pl.pallas_call(
        _drop_path_kernel,
        out_shape=jax.ShapeDtypeStruct((B, L), x2.dtype),
        grid=grid,
        in_specs=[
            pl.BlockSpec((TB, 1), lambda i, j: (i, 0)),    # per-sample scale (resident per row-tile)
            pl.BlockSpec((TB, TL), lambda i, j: (i, j)),   # x tile
        ],
        out_specs=pl.BlockSpec((TB, TL), lambda i, j: (i, j)),
        compiler_params=pltpu.CompilerParams(
            dimension_semantics=("parallel", "parallel"),
            vmem_limit_bytes=vmem_limit,
        ),
        cost_estimate=cost,
        # Reuse x's HBM buffer for the output when the caller donates x (halves HBM
        # footprint).  Off by default: without donation XLA would insert a defensive copy.
        input_output_aliases=({1: 0} if donate_x else {}),
    )(scale2, x2)

    return out.reshape(orig_shape)


# ------------------------------- module ------------------------------------ #

def _sample_keep_scale(key, batch, drop_prob, scale_by_keep):
    """Per-sample Bernoulli(keep_prob), optionally divided by keep_prob. Shape (B,), f32."""
    keep_prob = 1.0 - drop_prob
    keep = jax.random.bernoulli(key, p=keep_prob, shape=(batch,)).astype(jnp.float32)
    if scale_by_keep and keep_prob > 0.0:
        keep = keep / keep_prob
    return keep


class DropPathPallas:
    """Mirrors DropPath(drop_prob, scale_by_keep) forward semantics."""

    def __init__(self, drop_prob: float = 0.0, scale_by_keep: bool = True):
        self.drop_prob = float(drop_prob)
        self.scale_by_keep = bool(scale_by_keep)

    def __call__(self, x, *, training=False, key=None):
        if self.drop_prob == 0.0 or not training:
            return x  # identity, exactly like the PyTorch forward
        if key is None:
            raise ValueError("DropPathPallas needs a PRNG key in training mode.")
        # TODO(synk): mask uses jax.random, not torch's RNG stream (not bit-identical to torch).
        scale = _sample_keep_scale(key, x.shape[0], self.drop_prob, self.scale_by_keep)
        return drop_path_pallas(x, scale)


# ------------------------------ reference ----------------------------------- #

def _drop_path_reference(x, scale):
    bshape = (x.shape[0],) + (1,) * (x.ndim - 1)
    return x * scale.reshape(bshape).astype(x.dtype)


# --------------------------------- main -------------------------------------- #

if __name__ == "__main__":
    key = jax.random.PRNGKey(0)
    kx, kd, kx2, kd2 = jax.random.split(key, 4)

    # Small config implied by the module's typical use: (batch=2, seq=8, hidden=32).
    B, N, D = 2, 8, 32
    x = jax.random.normal(kx, (B, N, D), jnp.float32)

    mod = DropPathPallas(drop_prob=0.25, scale_by_keep=True)
    scale = _sample_keep_scale(kd, B, mod.drop_prob, mod.scale_by_keep)
    ref = _drop_path_reference(x, scale)

    # (a) Module API on the small shape (short-circuits to the fused XLA multiply).
    out_mod = jax.block_until_ready(mod(x, training=True, key=kd))
    assert out_mod.shape == x.shape
    assert jnp.allclose(out_mod, ref, atol=1e-6, rtol=1e-6)

    # (b) Force the Pallas kernel on the tiny shape (exercises small-B / split-lane tiles).
    out_small = jax.block_until_ready(drop_path_pallas(x, scale, min_pallas_bytes=0))
    assert jnp.allclose(out_small, ref, atol=1e-6, rtol=1e-6), \
        float(jnp.max(jnp.abs(out_small - ref)))

    # Eval / drop_prob==0 paths are identity.
    assert jnp.array_equal(mod(x, training=False, key=kd), x)
    assert jnp.array_equal(DropPathPallas(0.0)(x, training=True, key=kd), x)

    # (c) Medium f32 tensor: takes the Pallas path with budget-driven tiles.
    B2, N2, D2 = 16, 64, 256
    x_big = jax.random.normal(kx2, (B2, N2, D2), jnp.float32)
    scale_big = _sample_keep_scale(kd2, B2, 0.5, True)
    out_big = jax.block_until_ready(drop_path_pallas(x_big, scale_big))
    ref_big = _drop_path_reference(x_big, scale_big)
    assert jnp.allclose(out_big, ref_big, atol=1e-6, rtol=1e-6), \
        float(jnp.max(jnp.abs(out_big - ref_big)))

    # (d) bf16 path: multiply stays in packed 16-bit vregs (scale cast to bf16).
    x_bf = x_big.astype(jnp.bfloat16)
    out_bf = jax.block_until_ready(drop_path_pallas(x_bf, scale_big))
    ref_bf = _drop_path_reference(x_bf, scale_big)
    assert out_bf.dtype == jnp.bfloat16
    assert jnp.allclose(out_bf.astype(jnp.float32), ref_bf.astype(jnp.float32),
                        atol=1e-2, rtol=1e-2)

    # (e) Donated-input path under jit (output aliases x's HBM buffer).
    drop_jit = jax.jit(lambda xx, ss: drop_path_pallas(xx, ss, donate_x=True),
                       donate_argnums=(0,))
    out_don = jax.block_until_ready(drop_jit(x_big + 0.0, scale_big))
    assert jnp.allclose(out_don, ref_big, atol=1e-6, rtol=1e-6)

    print("KERNEL_OK")
</pallas_src>

<mosaic_0001>
module attributes {stable_mosaic.version = 11 : i64} {
  func.func @_drop_path_kernel(%arg0: i32, %arg1: i32, %arg2: memref<2x1xf32, #tpu.memory_space<vmem>>, %arg3: memref<2x128xf32, #tpu.memory_space<vmem>>, %arg4: memref<2x128xf32, #tpu.memory_space<vmem>>) attributes {dimension_semantics = [#tpu.dimension_semantics<parallel>, #tpu.dimension_semantics<parallel>], iteration_bounds = array<i64: 1, 2>, scalar_prefetch = 0 : i64, scratch_operands = 0 : i64, tpu.core_type = #tpu.core_type<tc>, window_params = [{transform_indices = @transform_0, window_bounds = array<i64: 2, 1>}, {transform_indices = @transform_1, window_bounds = array<i64: 2, 128>}, {transform_indices = @transform_2, window_bounds = array<i64: 2, 128>}]} {
    %c0 = arith.constant 0 : index
    %c0_0 = arith.constant 0 : index
    %0 = vector.load %arg3[%c0, %c0_0] : memref<2x128xf32, #tpu.memory_space<vmem>>, vector<2x128xf32>
    %c0_1 = arith.constant 0 : index
    %c0_2 = arith.constant 0 : index
    %1 = vector.load %arg2[%c0_1, %c0_2] : memref<2x1xf32, #tpu.memory_space<vmem>>, vector<2x1xf32>
    %2 = vector.broadcast %1 : vector<2x1xf32> to vector<2x128xf32>
    %3 = arith.mulf %0, %2 : vector<2x128xf32>
    %c0_3 = arith.constant 0 : index
    %c0_4 = arith.constant 0 : index
    %4 = vector.load %arg4[%c0_3, %c0_4] : memref<2x128xf32, #tpu.memory_space<vmem>>, vector<2x128xf32>
    tpu.vector_store %arg4[%c0_3, %c0_4], %3 {strides = array<i32>} : memref<2x128xf32, #tpu.memory_space<vmem>>, vector<2x128xf32>,
    return
  }
  func.func @transform_0(%arg0: i32, %arg1: i32) -> (i32, i32) {
    %c0_i32 = arith.constant 0 : i32
    %c0_i32_0 = arith.constant 0 : i32
    return %arg0, %c0_i32 : i32, i32
  }
  func.func @transform_1(%arg0: i32, %arg1: i32) -> (i32, i32) {
    %c0_i32 = arith.constant 0 : i32
    return %arg0, %arg1 : i32, i32
  }
  func.func @transform_2(%arg0: i32, %arg1: i32) -> (i32, i32) {
    %c0_i32 = arith.constant 0 : i32
    return %arg0, %arg1 : i32, i32
  }
}

</mosaic_0001>

<bundles_post_ra>
// kernel: tpu_custom_call.1
= control target key start
LH: loop header
LB: loop body
LE: loop exit
PB: predicated region body
PF: predicated region fallthrough
CT: control target
= control target key end

     0   :  { %7 = vsyncpa [#allocation3], 0  ;;  %s580_s0 = inlined_call_operand.vmem [shape: f32[2,1], index: 0, kind: input, shape index: {}]   ;;  %s581_s1 = inlined_call_operand.vmem [shape: f32[2,256], index: 1, kind: input, shape index: {}]   ;;  %s582_s2 = inlined_call_operand.hbm [shape: f32[2,256], index: 2, kind: output, shape index: {}]  }
   0x1   :  { %9 = vsyncpa [#allocation3 + $0x1], 0  ;;  %s465_s9 = smov 0   ;;  %s467_s10 = smov 0  }
   0x2   :  { %s469_s11 = smov 0   ;;  %s471_s12 = smov 0  }
   0x3   :  { %s473_s13 = smov 0   ;;  %s475_s14 = smov 0  }
   0x4 LB: > { %s299_s15 = sadd.s32 4294967295, %s446_s14   ;;  %s300_s16 = sadd.s32 4294967294, %s446_s14   ;;  %s446_s14 = sphi %s475_s14, %s15_s14   ;;  %s442_s13 = sphi %s473_s13, %s589_s13   ;;  %s438_s12 = sphi %s471_s12, %s588_s12   ;;  %s434_s11 = sphi %s469_s11, %s587_s11   ;;  %s430_s10 = sphi %s467_s10, %s586_s10   ;;  %s426_s9 = sphi %s465_s9, %s585_s9  }
   0x5   : > { %s24_s17 = sadd.s32 1, %s442_s13  ;;  %s90_s18 = sadd.s32 1, %s434_s11 }
   0x6   : > { %p25_p0 = scmp.ge.s32.totalorder %s24_s17, 2  ;;  %p100_p1 = scmp.ne.s32.totalorder %s434_s11, %s430_s10 }
   0x7   : > { %p101_p2 = scmp.eq.s32.totalorder %s299_s15, 1  ;;  %p106_p3 = scmp.ne.s32.totalorder %s430_s10, %s426_s9 }
   0x8   : > { %s591_s17 = smov (%p25_p0, %s24_s17), 0  ;;  %p107_p5 = scmp.eq.s32.totalorder %s300_s16, 1 }
   0x9   : > { %p505_p4 = por %p101_p2, %p100_p1  ;;  %s86_s20 = ssub.s32 %s442_s13, %s591_s17 }
   0xa   : > { %p304_p6 = scmp.ge.s32.totalorder %s446_s14, 1  ;;  %p88_p7 = scmp.eq.s32.totalorder %s86_s20, 0 }
   0xb   : > { %p512_p8 = por %p107_p5, %p106_p3  ;;  %p143_p9 = scmp.lt.s32.totalorder %s446_s14, 3 }
   0xc   : > { %s518_s22 = scalar_select %p88_p7, %s434_s11, %s90_s18  }
   0xd   : > { %p144_p10 = pnand %p304_p6, %p143_p9 }
   0xe   : > { %v185_v0 = vld [vmem:[%s580_s0] sm:$0x3] (!%p144_p10)  ;;  %v448_v1 = vmov (!%p144_p10), 0   ;;  %p178_p11 = scmp.lt.s32.totalorder (!%p144_p10), %s438_s12, 1  ;;  %s169_s26 = sand.u32 (!%p144_p10), 1, %s430_s10  }
   0xf   : > { %147 = sbr.rel (%p144_p10) target bundleno = 160 (0xa0), region = 28  ;;  %367 = vset.pattern.permute.xlu0 (!%p144_p10), %v448_v1  ;;  %s305_s27 = sshll.u32 (!%p144_p10), %s169_s26, 1 }
  0x10   : > { %188 = vperm.xlu0 (!%p144_p10), %367, %v185_v0   ;;  %s308_s4 = sshll.u32 (!%p144_p10), %s438_s12, 5  ;;  %s171_s5 = scalar_lea.vmem (!%p144_p10), [#allocation2], %s305_s27 }
  0x11   : > { %s209_s6 = sshll.u32 (!%p144_p10), %s171_s5, 4  ;;  %s533_s15 = scalar_lea.hbm (!%p144_p10), %s582_s2, %s308_s4  ;;  %s535_s6 = int_to_ptr.vmem [resolvable:$true] %s209_s6 }
  0x12   : > { %s194_s16 = scalar_lea.sflag (!%p144_p10), [#allocation3], %s169_s26  ;;  %s368_s18 = scalar_lea.vmem (!%p144_p10), %s535_s6, 32 }
  0x13   : > { %p369_p12 = scmp.ne.s32.totalorder (!%p144_p10), %s535_s6, %s368_s18 }
  0x15   : > { %p370_p13 = pnand (!%p144_p10), %p369_p12, %p505_p4 }
  0x16   : > { %s179_s25 = scalar_select %p178_p11, %s438_s12, 1 }
  0x17   : > { %p371_p0 = pneg %p370_p13  ;;  %s449_s12 = smov [#allocation2]  }
  0x18   : > { %s306_s28 = sshll.u32 %s179_s25, 1  ;;  %s372_s20 = sshll.u32 %s449_s12, 4  ;;  %s373_s20 = int_to_ptr.vmem [resolvable:$false] %s372_s20 }
  0x19   : > { %s183_s3 = scalar_lea.vmem %s581_s1, %s306_s28  ;;  %s374_s23 = scalar_lea.vmem %s373_s20, 64 }
  0x1a   : > { %v184_v2 = vld [vmem:[%s183_s3] sm:$0x3]  ;;  %p375_p1 = scmp.lt.s32.totalorder %s535_s6, %s373_s20  ;;  %p376_p2 = scmp.lt.s32.totalorder %s374_s23, %s368_s18 }
  0x1c   : > { %p377_p3 = por %p376_p2, %p375_p1 }
  0x1e   : > { %p378_p5 = pnand %p377_p3, %p371_p0 }
  0x8f   : > { %v189_v3 = vpop.permute.xlu0 %188 }
  0x90   : > { %v191_v4 = vmul.f32 %v189_v3, %v184_v2 }
  0x92   : > { %192 = vst [vmem:[%s171_s5] sm:$0x3] %v191_v4 }
  0x93   : > { %381 = shalt.err (!%p378_p5)
}
  0x94   : > { %s382_s24 = scalar_lea.hbm %s533_s15, 32  ;;  %s386_s27 = scalar_lea.hbm %s582_s2, 64 }
  0x95   : > { %p383_p6 = scmp.ne.s32.totalorder %s533_s15, %s382_s24  ;;  %p387_p10 = scmp.lt.u32.totalorder %s533_s15, %s582_s2 }
  0x96   : > { %p388_p11 = scmp.lt.u32.totalorder %s386_s27, %s382_s24  ;;  %p390_p13 = scmp.lt.u32.totalorder %s382_s24, %s533_s15 }
  0x97   : > { %p384_p7 = pnand %p383_p6, %p505_p4 }
  0x98   : > { %p389_p12 = por %p388_p11, %p387_p10 }
  0x99   : > { %p385_p9 = pneg %p384_p7 }
  0x9a   : > { %p391_p0 = por %p390_p13, %p389_p12 }
  0x9c   : > { %p392_p1 = pnand %p391_p0, %p385_p9 }
  0x9e   : > { %395 = shalt.err (!%p392_p1)
}
  0x9f   : > { %311 = dma.vmem_to_hbm [thread:$0]  (%p505_p4), %s535_s6, 32, %s533_s15, %s194_s16  }
  0xa0 PF: > { %p317_p2 = scmp.ge.s32.totalorder %s446_s14, 2  ;;  %s221_s30 = sand.u32 1, %s426_s9  }
  0xa1   : > { %s222_s3 = scalar_lea.sflag [#allocation3], %s221_s30 }
  0xa2   : > { %p314_p3 = pnand %p317_p2, %p512_p8 }
  0xa4   : > { %421 = dma.done.wait (!%p314_p3), %s222_s3, 32  }
  0xa5   : > { %423 = vsyncadd (!%p314_p3), %s222_s3, 4294967264  ;;  %s15_s14 = sadd.s32 1, %s446_s14   ;;  %s585_s9 = smov %s430_s10 }
  0xa6   : > { %p12_p5 = scmp.ge.s32.totalorder %s15_s14, 4   ;;  %s586_s10 = smov %s434_s11 }
  0xa7   : > { %s587_s11 = smov %s518_s22  ;;  %s588_s12 = smov %s442_s13 }
  0xa8   : > { %s589_s13 = smov %s591_s17  ;;  %14 = sbr.rel (!%p12_p5) target bundleno = 4 (0x4), region = 66 }
  0xaf   :  { %227 = vsyncpa [#allocation3], 1 }
  0xb0   :  { %229 = vsyncpa [#allocation3 + $0x1], 1 }

</bundles_post_ra>
